<compile_context>
chip_gen: v7x
topology: tpu7x:2x2x1
jax: 0.10.0
libtpu: 0.0.40
codegen_flags: <defaults>
</compile_context>

<pallas_src>
import functools

import jax
import jax.numpy as jnp
from jax.experimental import pallas as pl
from jax.experimental.pallas import tpu as pltpu

_BN_EPS = 1e-5
_ACT_DTYPE = jnp.bfloat16   # dtype fed to the MXU / stored between layers


def _round_up(x, m):
    return (x + m - 1) // m * m


def _pick_tile(dim, cap):
    """Largest power-of-two-ish tile <= cap that divides dim (else None)."""
    for t in (512, 256, 128, 64, 32, 16, 8):
        if t <= cap and dim % t == 0:
            return t
    return None


# ----------------------------- Pallas kernels -----------------------------

def _mm_bn_kernel(a_ref, b_ref, s_ref, c_ref, o_ref, acc_ref, *, relu):
    """Tiled matmul with BN(scale,bias) [+ReLU] fused into the finalize step."""
    @pl.when(pl.program_id(2) == 0)
    def _():
        acc_ref[...] = jnp.zeros_like(acc_ref)

    acc_ref[...] += jnp.dot(a_ref[...], b_ref[...],
                            preferred_element_type=jnp.float32)

    @pl.when(pl.program_id(2) == pl.num_programs(2) - 1)
    def _():
        y = acc_ref[...] * s_ref[...] + c_ref[...]
        if relu:
            y = jnp.maximum(y, 0.0)
        o_ref[...] = y.astype(o_ref.dtype)


def _mm_bn_res_kernel(a_ref, b_ref, s_ref, c_ref, r_ref, o_ref, acc_ref):
    """Tiled matmul with BN + residual add + ReLU fused into the finalize."""
    @pl.when(pl.program_id(2) == 0)
    def _():
        acc_ref[...] = jnp.zeros_like(acc_ref)

    acc_ref[...] += jnp.dot(a_ref[...], b_ref[...],
                            preferred_element_type=jnp.float32)

    @pl.when(pl.program_id(2) == pl.num_programs(2) - 1)
    def _():
        y = (acc_ref[...] * s_ref[...] + c_ref[...]
             + r_ref[...].astype(jnp.float32))
        o_ref[...] = jnp.maximum(y, 0.0).astype(o_ref.dtype)


def _conv_direct_kernel(x_ref, w_ref, s_ref, b_ref, o_ref, *, kh, kw, wp, relu):
    """Per-image direct (stride-1) conv: accumulate kh*kw shifted flat windows
    of the padded input, then apply BN(+ReLU) and store.  x_ref is the image's
    padded input flattened to (1, Hp*Wp, Cin); each tap is a contiguous
    (Ho*Wp, Cin) slab (rows with wo >= Wo are padding garbage, dropped by the
    caller)."""
    lm = o_ref.shape[1]                 # Ho * Wp
    cout = o_ref.shape[2]
    acc = jnp.zeros((lm, cout), jnp.float32)
    for di in range(kh):
        for dj in range(kw):
            off = di * wp + dj          # static offset
            tap = x_ref[0, pl.ds(off, lm), :]          # (lm, Cin) bf16
            acc = acc + jnp.dot(tap, w_ref[di * kw + dj],
                                preferred_element_type=jnp.float32)
    y = acc * s_ref[...] + b_ref[...]
    if relu:
        y = jnp.maximum(y, 0.0)
    o_ref[0] = y.astype(o_ref.dtype)


def _maxpool_kernel(x_ref, o_ref):
    """3x3/2 maxpool from the 4 parity-decimated planes of one padded image.
    x_ref: (4, Hp2, Wp2, C) planes, o_ref: (1, Ho, Wo, C)."""
    _, ho, wo, _ = o_ref.shape
    res = None
    for di in range(3):
        for dj in range(3):
            a, b = di % 2, dj % 2
            tap = x_ref[2 * a + b, pl.ds(di // 2, ho), pl.ds(dj // 2, wo), :]
            res = tap if res is None else jnp.maximum(res, tap)
    o_ref[0] = res


def _mean_kernel(x_ref, o_ref):
    # x: (1, H*W, C) -> mean over spatial positions, f32 output.
    o_ref[...] = jnp.mean(x_ref[...].astype(jnp.float32), axis=1,
                          keepdims=True)


# ----------------------------- kernel wrappers -----------------------------

def matmul_bn_fused(a, w, scale, bias, residual=None, relu=True,
                    out_dtype=_ACT_DTYPE):
    """(M, K) @ (K, N) with BN scale/bias (+residual, +ReLU) fused epilogue."""
    M, K = a.shape
    K2, N = w.shape
    assert K == K2
    s2 = scale.reshape(1, N).astype(jnp.float32)
    b2 = bias.reshape(1, N).astype(jnp.float32)

    tm = _pick_tile(M, 256)
    tn = _pick_tile(N, 256)
    tk = _pick_tile(K, 512)
    Mp, Kp, Np = M, K, N
    # Padding of the activation matrix is only taken when no clean tile
    # divisor exists (e.g. the stem's K = 147).
    if tm is None:
        tm = min(256, _round_up(M, 8))
        Mp = _round_up(M, tm)
    if tk is None:
        tk = 128
        Kp = _round_up(K, tk)
    if tn is None:
        tn = 128
        Np = _round_up(N, tn)
    if (Mp, Kp) != (M, K):
        a = jnp.pad(a, ((0, Mp - M), (0, Kp - K)))
    if (Kp, Np) != (K, N):
        w = jnp.pad(w, ((0, Kp - K), (0, Np - N)))
    if Np != N:
        s2 = jnp.pad(s2, ((0, 0), (0, Np - N)))
        b2 = jnp.pad(b2, ((0, 0), (0, Np - N)))
    if residual is not None and (Mp, Np) != (M, N):
        residual = jnp.pad(residual, ((0, Mp - M), (0, Np - N)))

    in_specs = [
        pl.BlockSpec((tm, tk), lambda i, j, k: (i, k)),
        pl.BlockSpec((tk, tn), lambda i, j, k: (k, j)),
        pl.BlockSpec((1, tn), lambda i, j, k: (0, j)),
        pl.BlockSpec((1, tn), lambda i, j, k: (0, j)),
    ]
    inputs = [a, w, s2, b2]
    if residual is not None:
        in_specs.append(pl.BlockSpec((tm, tn), lambda i, j, k: (i, j)))
        inputs.append(residual)
        kernel = _mm_bn_res_kernel
    else:
        kernel = functools.partial(_mm_bn_kernel, relu=relu)

    bytes_accessed = (a.size * a.dtype.itemsize + w.size * w.dtype.itemsize
                      + Mp * Np * jnp.dtype(out_dtype).itemsize)
    if residual is not None:
        bytes_accessed += residual.size * residual.dtype.itemsize

    out = pl.pallas_call(
        kernel,
        out_shape=jax.ShapeDtypeStruct((Mp, Np), out_dtype),
        grid=(Mp // tm, Np // tn, Kp // tk),
        in_specs=in_specs,
        out_specs=pl.BlockSpec((tm, tn), lambda i, j, k: (i, j)),
        scratch_shapes=[pltpu.VMEM((tm, tn), jnp.float32)],
        compiler_params=pltpu.CompilerParams(
            dimension_semantics=("parallel", "parallel", "arbitrary")),
        cost_estimate=pl.CostEstimate(flops=2 * Mp * Kp * Np,
                                      transcendentals=0,
                                      bytes_accessed=bytes_accessed),
    )(*inputs)
    if (Mp, Np) != (M, N):
        out = out[:M, :N]
    return out


def conv1x1_bn(x, w_mat, scale, bias, stride=1, relu=True, residual=None):
    """1x1 convolution (optionally strided) + BN (+residual, +ReLU) fused."""
    N, H, W, Cin = x.shape
    if stride > 1:
        x = x[:, ::stride, ::stride, :]
        H, W = x.shape[1], x.shape[2]
    a = x.reshape(N * H * W, Cin)
    r = residual.reshape(N * H * W, -1) if residual is not None else None
    out = matmul_bn_fused(a, w_mat, scale, bias, residual=r, relu=relu)
    return out.reshape(N, H, W, -1)


def conv3x3_bn_relu(x, w_taps, scale, bias):
    """Stride-1 3x3 conv (pad=1) fused with BN+ReLU; per-image direct conv,
    no im2col materialisation in HBM."""
    N, H, W, Cin = x.shape
    KH = KW = 3
    pad = 1
    Cout = w_taps.shape[-1]
    Ho, Wo = H, W
    # one extra bottom row so every tap's flat window stays in range
    xp = jnp.pad(x, ((0, 0), (pad, pad + 1), (pad, pad), (0, 0)))
    Hp, Wp = H + 2 * pad + 1, W + 2 * pad
    xf = xp.reshape(N, Hp * Wp, Cin)
    lm = Ho * Wp
    s2 = scale.reshape(1, Cout).astype(jnp.float32)
    b2 = bias.reshape(1, Cout).astype(jnp.float32)

    kernel = functools.partial(_conv_direct_kernel, kh=KH, kw=KW, wp=Wp,
                               relu=True)
    out = pl.pallas_call(
        kernel,
        out_shape=jax.ShapeDtypeStruct((N, lm, Cout), _ACT_DTYPE),
        grid=(N,),
        in_specs=[
            pl.BlockSpec((1, Hp * Wp, Cin), lambda n: (n, 0, 0)),
            pl.BlockSpec((KH * KW, Cin, Cout), lambda n: (0, 0, 0)),
            pl.BlockSpec((1, Cout), lambda n: (0, 0)),
            pl.BlockSpec((1, Cout), lambda n: (0, 0)),
        ],
        out_specs=pl.BlockSpec((1, lm, Cout), lambda n: (n, 0, 0)),
        compiler_params=pltpu.CompilerParams(
            dimension_semantics=("parallel",)),
        cost_estimate=pl.CostEstimate(
            flops=2 * N * lm * KH * KW * Cin * Cout,
            transcendentals=0,
            bytes_accessed=(xf.size * 2 + w_taps.size * 2
                            + N * lm * Cout * 2)),
    )(xf, w_taps, s2, b2)
    # columns wo >= Wo in each output row stripe are padding garbage: drop.
    return out.reshape(N, Ho, Wp, Cout)[:, :, :Wo, :]


def _im2col(x, kh, kw, stride, pad):
    N, H, W, C = x.shape
    Ho = (H + 2 * pad - kh) // stride + 1
    Wo = (W + 2 * pad - kw) // stride + 1
    xp = jnp.pad(x, ((0, 0), (pad, pad), (pad, pad), (0, 0))) if pad else x
    cols = []
    for i in range(kh):
        for j in range(kw):
            patch = jax.lax.slice(
                xp, (0, i, j, 0),
                (N, i + (Ho - 1) * stride + 1, j + (Wo - 1) * stride + 1, C),
                (1, stride, stride, 1))
            cols.append(patch)
    col = jnp.stack(cols, axis=3)                  # (N, Ho, Wo, kh*kw, C)
    return col.reshape(N * Ho * Wo, kh * kw * C), (N, Ho, Wo)


def conv_bn_im2col(x, w_mat, kh, kw, stride, pad, scale, bias, relu=True):
    """im2col + fused matmul.  Only used for the 7x7 stem and the three
    stride-2 3x3 convs."""
    cols, (N, Ho, Wo) = _im2col(x, kh, kw, stride, pad)
    out = matmul_bn_fused(cols, w_mat, scale, bias, relu=relu)
    return out.reshape(N, Ho, Wo, -1)


def maxpool_3x3_s2_p1(x):
    N, H, W, C = x.shape
    assert H % 2 == 0 and W % 2 == 0
    Ho, Wo = H // 2, W // 2
    Hp2, Wp2 = Ho + 1, Wo + 1
    xp = jnp.pad(x, ((0, 0), (1, 1), (1, 1), (0, 0)),
                 constant_values=-jnp.inf)
    # 4 parity planes so the kernel only needs unit-stride slices
    # (one extra HBM copy of the input, not 9x the pooled tensor).
    planes = jnp.stack([xp[:, a::2, b::2, :] for a in (0, 1) for b in (0, 1)],
                       axis=1).reshape(N * 4, Hp2, Wp2, C)
    return pl.pallas_call(
        _maxpool_kernel,
        out_shape=jax.ShapeDtypeStruct((N, Ho, Wo, C), x.dtype),
        grid=(N,),
        in_specs=[pl.BlockSpec((4, Hp2, Wp2, C), lambda n: (n, 0, 0, 0))],
        out_specs=pl.BlockSpec((1, Ho, Wo, C), lambda n: (n, 0, 0, 0)),
        compiler_params=pltpu.CompilerParams(
            dimension_semantics=("parallel",)),
    )(planes)


def spatial_mean(x):
    N, H, W, C = x.shape
    xr = x.reshape(N, H * W, C)
    out = pl.pallas_call(
        _mean_kernel,
        out_shape=jax.ShapeDtypeStruct((N, 1, C), jnp.float32),
        grid=(N,),
        in_specs=[pl.BlockSpec((1, H * W, C), lambda n: (n, 0, 0))],
        out_specs=pl.BlockSpec((1, 1, C), lambda n: (n, 0, 0)),
        compiler_params=pltpu.CompilerParams(
            dimension_semantics=("parallel",)),
    )(xr)
    return out.reshape(N, 1, 1, C)


# ----------------------------- ResNet-101 model -----------------------------

def bottleneck_forward(x, p):
    stride = p["stride"]
    if "down_w" in p:
        identity = conv1x1_bn(x, p["down_w"], p["down_s"], p["down_b"],
                              stride=stride, relu=False)
    else:
        identity = x
    out = conv1x1_bn(x, p["w1"], p["s1"], p["b1"], relu=True)
    if stride == 1:
        out = conv3x3_bn_relu(out, p["w2"], p["s2"], p["b2"])
    else:
        # TODO(synk): stride-2 3x3 convs (3 of ~33) still use im2col.
        out = conv_bn_im2col(out, p["w2"], 3, 3, stride, 1,
                             p["s2"], p["b2"], relu=True)
    return conv1x1_bn(out, p["w3"], p["s3"], p["b3"], relu=True,
                      residual=identity)


def resnet101_forward(x_nchw, params):
    x = jnp.transpose(x_nchw, (0, 2, 3, 1)).astype(_ACT_DTYPE)  # NCHW -> NHWC
    # TODO(synk): the 7x7 stem conv still uses im2col (single conv, K=147).
    x = conv_bn_im2col(x, params["stem_w"], 7, 7, 2, 3,
                       params["stem_s"], params["stem_b"], relu=True)
    x = maxpool_3x3_s2_p1(x)
    for blk in params["layer1"]:
        x = bottleneck_forward(x, blk)
    for blk in params["layer2"]:
        x = bottleneck_forward(x, blk)
    for blk in params["layer3"]:
        x = bottleneck_forward(x, blk)
    feature3 = x
    for blk in params["layer4"]:
        x = bottleneck_forward(x, blk)
    feature4 = x
    tail = spatial_mean(feature4)                  # (N, 1, 1, C) f32
    to_nchw = lambda t: jnp.transpose(t.astype(jnp.float32), (0, 3, 1, 2))
    return to_nchw(feature3), to_nchw(feature4), to_nchw(tail)


# ----------------------------- parameter init -----------------------------

def _conv_w(key, cout, cin, kh, kw):
    std = (1.0 / (cin * kh * kw)) ** 0.5
    return std * jax.random.normal(key, (cout, cin, kh, kw), jnp.float32)


def _bn_params(key, c):
    k1, k2, k3, k4 = jax.random.split(key, 4)
    return dict(
        gamma=1.0 + 0.1 * jax.random.normal(k1, (c,), jnp.float32),
        beta=0.1 * jax.random.normal(k2, (c,), jnp.float32),
        mean=0.1 * jax.random.normal(k3, (c,), jnp.float32),
        var=1.0 + 0.1 * jax.random.uniform(k4, (c,), jnp.float32),
    )


def _bottleneck_params(key, inplanes, planes, stride, downsample):
    ks = jax.random.split(key, 8)
    p = dict(
        stride=stride,
        conv1=_conv_w(ks[0], planes, inplanes, 1, 1),
        bn1=_bn_params(ks[1], planes),
        conv2=_conv_w(ks[2], planes, planes, 3, 3),
        bn2=_bn_params(ks[3], planes),
        conv3=_conv_w(ks[4], planes * 4, planes, 1, 1),
        bn3=_bn_params(ks[5], planes * 4),
    )
    if downsample:
        p["down_conv"] = _conv_w(ks[6], planes * 4, inplanes, 1, 1)
        p["down_bn"] = _bn_params(ks[7], planes * 4)
    return p


def _layer_params(key, inplanes, planes, blocks, stride):
    ks = jax.random.split(key, blocks)
    layer = [_bottleneck_params(ks[0], inplanes, planes, stride, True)]
    for i in range(1, blocks):
        layer.append(_bottleneck_params(ks[i], planes * 4, planes, 1, False))
    return layer


def init_resnet101_params(key):
    ks = jax.random.split(key, 6)
    return dict(
        conv1=_conv_w(ks[0], 64, 3, 7, 7),
        bn1=_bn_params(ks[1], 64),
        layer1=_layer_params(ks[2], 64, 64, 3, 1),
        layer2=_layer_params(ks[3], 256, 128, 4, 2),
        layer3=_layer_params(ks[4], 512, 256, 23, 2),
        layer4=_layer_params(ks[5], 1024, 512, 3, 2),
    )


# --------------------- one-time kernel-layout conversion ---------------------

def _bn_scale_bias(bn):
    scale = bn["gamma"] / jnp.sqrt(bn["var"] + _BN_EPS)
    bias = bn["beta"] - bn["mean"] * scale
    return scale.astype(jnp.float32), bias.astype(jnp.float32)


def _w_to_mat(w):            # OIHW -> (kh*kw*Cin, Cout), bf16
    cout, cin, kh, kw = w.shape
    return jnp.transpose(w, (2, 3, 1, 0)).reshape(kh * kw * cin,
                                                  cout).astype(_ACT_DTYPE)


def _w_to_taps(w):           # OIHW -> (kh*kw, Cin, Cout), bf16
    cout, cin, kh, kw = w.shape
    return jnp.transpose(w, (2, 3, 1, 0)).reshape(kh * kw, cin,
                                                  cout).astype(_ACT_DTYPE)


def _prepare_block(p):
    s1, b1 = _bn_scale_bias(p["bn1"])
    s2, b2 = _bn_scale_bias(p["bn2"])
    s3, b3 = _bn_scale_bias(p["bn3"])
    blk = dict(stride=p["stride"],
               w1=_w_to_mat(p["conv1"]), s1=s1, b1=b1,
               s2=s2, b2=b2,
               w3=_w_to_mat(p["conv3"]), s3=s3, b3=b3)
    blk["w2"] = (_w_to_taps(p["conv2"]) if p["stride"] == 1
                 else _w_to_mat(p["conv2"]))
    if "down_conv" in p:
        ds, db = _bn_scale_bias(p["down_bn"])
        blk["down_w"] = _w_to_mat(p["down_conv"])
        blk["down_s"] = ds
        blk["down_b"] = db
    return blk


def prepare_params(raw):
    s, b = _bn_scale_bias(raw["bn1"])
    return dict(stem_w=_w_to_mat(raw["conv1"]), stem_s=s, stem_b=b,
                layer1=[_prepare_block(p) for p in raw["layer1"]],
                layer2=[_prepare_block(p) for p in raw["layer2"]],
                layer3=[_prepare_block(p) for p in raw["layer3"]],
                layer4=[_prepare_block(p) for p in raw["layer4"]])


# ----------------------------------- main -----------------------------------

if __name__ == "__main__":
    key = jax.random.PRNGKey(0)
    kx, kp = jax.random.split(key)

    # ---- lightweight numerical self-check of the two fused conv kernels ----
    kc = jax.random.split(key, 4)
    bn_chk = _bn_params(kc[2], 64)
    s_chk, b_chk = _bn_scale_bias(bn_chk)

    xa = jax.random.normal(kc[0], (2, 8, 8, 128), jnp.float32).astype(_ACT_DTYPE)
    wa = 0.05 * jax.random.normal(kc[1], (64, 128, 1, 1), jnp.float32)
    got1 = conv1x1_bn(xa, _w_to_mat(wa), s_chk, b_chk, relu=True)
    ref1 = jnp.einsum("nhwc,oc->nhwo", xa.astype(jnp.float32), wa[:, :, 0, 0])
    ref1 = jnp.maximum(ref1 * s_chk + b_chk, 0.0)
    assert bool(jnp.allclose(got1.astype(jnp.float32), ref1,
                             rtol=5e-2, atol=5e-2))

    xb = jax.random.normal(kc[3], (2, 8, 8, 64), jnp.float32).astype(_ACT_DTYPE)
    wb = 0.05 * jax.random.normal(kc[2], (64, 64, 3, 3), jnp.float32)
    got2 = conv3x3_bn_relu(xb, _w_to_taps(wb), s_chk, b_chk)
    ref2 = jax.lax.conv_general_dilated(
        xb.astype(jnp.float32), jnp.transpose(wb, (2, 3, 1, 0)),
        window_strides=(1, 1), padding="SAME",
        dimension_numbers=("NHWC", "HWIO", "NHWC"))
    ref2 = jnp.maximum(ref2 * s_chk + b_chk, 0.0)
    assert bool(jnp.allclose(got2.astype(jnp.float32), ref2,
                             rtol=5e-2, atol=5e-2))

    # ------------------------------ full forward ------------------------------
    x = jax.random.normal(kx, (2, 3, 64, 64), jnp.float32)      # NCHW input
    raw = init_resnet101_params(kp)
    params = prepare_params(raw)    # bf16 kernel-layout weights, folded BN

    feature3, feature4, tail = resnet101_forward(x, params)
    jax.block_until_ready((feature3, feature4, tail))

    assert feature3.shape == (2, 1024, 4, 4), feature3.shape
    assert feature4.shape == (2, 2048, 2, 2), feature4.shape
    assert tail.shape == (2, 2048, 1, 1), tail.shape
    assert bool(jnp.isfinite(feature3).all())
    assert bool(jnp.isfinite(feature4).all())
    assert bool(jnp.isfinite(tail).all())
    print("KERNEL_OK")
</pallas_src>

<mosaic_0001>
module attributes {stable_mosaic.version = 11 : i64} {
  func.func @_mm_bn_kernel(%arg0: i32, %arg1: i32, %arg2: i32, %arg3: memref<128x128xbf16, #tpu.memory_space<vmem>>, %arg4: memref<128x64xbf16, #tpu.memory_space<vmem>>, %arg5: memref<1x64xf32, #tpu.memory_space<vmem>>, %arg6: memref<1x64xf32, #tpu.memory_space<vmem>>, %arg7: memref<128x64xbf16, #tpu.memory_space<vmem>>, %arg8: memref<128x64xf32, #tpu.memory_space<vmem>>) attributes {dimension_semantics = [#tpu.dimension_semantics<parallel>, #tpu.dimension_semantics<parallel>, #tpu.dimension_semantics<arbitrary>], iteration_bounds = array<i64: 1, 1, 1>, scalar_prefetch = 0 : i64, scratch_operands = 1 : i64, tpu.core_type = #tpu.core_type<tc>, window_params = [{transform_indices = @transform_0, window_bounds = array<i64: 128, 128>}, {transform_indices = @transform_1, window_bounds = array<i64: 128, 64>}, {transform_indices = @transform_2, window_bounds = array<i64: 1, 64>}, {transform_indices = @transform_3, window_bounds = array<i64: 1, 64>}, {transform_indices = @transform_4, window_bounds = array<i64: 128, 64>}]} {
    %c0_i32 = arith.constant 0 : i32
    %0 = arith.cmpi eq, %arg2, %c0_i32 : i32
    %1 = arith.extui %0 : i1 to i32
    %c0_i32_0 = arith.constant 0 : i32
    %2 = arith.cmpi ne, %1, %c0_i32_0 : i32
    scf.if %2 {
      %cst_10 = arith.constant 0.000000e+00 : f32
      %12 = vector.broadcast %cst_10 : f32 to vector<128x64xf32>
      %c0_11 = arith.constant 0 : index
      %c0_12 = arith.constant 0 : index
      %13 = vector.load %arg8[%c0_11, %c0_12] : memref<128x64xf32, #tpu.memory_space<vmem>>, vector<128x64xf32>
      tpu.vector_store %arg8[%c0_11, %c0_12], %12 {strides = array<i32>} : memref<128x64xf32, #tpu.memory_space<vmem>>, vector<128x64xf32>,
    } else {
    }
    %c0 = arith.constant 0 : index
    %c0_1 = arith.constant 0 : index
    %3 = vector.load %arg8[%c0, %c0_1] : memref<128x64xf32, #tpu.memory_space<vmem>>, vector<128x64xf32>
    %c0_2 = arith.constant 0 : index
    %c0_3 = arith.constant 0 : index
    %4 = vector.load %arg3[%c0_2, %c0_3] : memref<128x128xbf16, #tpu.memory_space<vmem>>, vector<128x128xbf16>
    %c0_4 = arith.constant 0 : index
    %c0_5 = arith.constant 0 : index
    %5 = vector.load %arg4[%c0_4, %c0_5] : memref<128x64xbf16, #tpu.memory_space<vmem>>, vector<128x64xbf16>
    %cst = arith.constant dense<0.000000e+00> : vector<128x64xf32>
    %6 = tpu.matmul %4, %5, %cst {dimension_numbers = #tpu.dot_dimension_numbers<[1], [0], [0], [1], [0, 0, 1, 1], [], []>} : vector<128x128xbf16>, vector<128x64xbf16>, vector<128x64xf32> -> vector<128x64xf32>
    %7 = arith.addf %3, %6 : vector<128x64xf32>
    %c0_6 = arith.constant 0 : index
    %c0_7 = arith.constant 0 : index
    %8 = vector.load %arg8[%c0_6, %c0_7] : memref<128x64xf32, #tpu.memory_space<vmem>>, vector<128x64xf32>
    tpu.vector_store %arg8[%c0_6, %c0_7], %7 {strides = array<i32>} : memref<128x64xf32, #tpu.memory_space<vmem>>, vector<128x64xf32>,
    %c0_i32_8 = arith.constant 0 : i32
    %9 = arith.cmpi eq, %arg2, %c0_i32_8 : i32
    %10 = arith.extui %9 : i1 to i32
    %c0_i32_9 = arith.constant 0 : i32
    %11 = arith.cmpi ne, %10, %c0_i32_9 : i32
    scf.if %11 {
      %c0_10 = arith.constant 0 : index
      %c0_11 = arith.constant 0 : index
      %12 = vector.load %arg8[%c0_10, %c0_11] : memref<128x64xf32, #tpu.memory_space<vmem>>, vector<128x64xf32>
      %c0_12 = arith.constant 0 : index
      %c0_13 = arith.constant 0 : index
      %13 = vector.load %arg5[%c0_12, %c0_13] : memref<1x64xf32, #tpu.memory_space<vmem>>, vector<1x64xf32>
      %14 = vector.broadcast %13 : vector<1x64xf32> to vector<128x64xf32>
      %15 = arith.mulf %12, %14 : vector<128x64xf32>
      %c0_14 = arith.constant 0 : index
      %c0_15 = arith.constant 0 : index
      %16 = vector.load %arg6[%c0_14, %c0_15] : memref<1x64xf32, #tpu.memory_space<vmem>>, vector<1x64xf32>
      %17 = vector.broadcast %16 : vector<1x64xf32> to vector<128x64xf32>
      %18 = arith.addf %15, %17 : vector<128x64xf32>
      %cst_16 = arith.constant 0.000000e+00 : f32
      %19 = vector.broadcast %cst_16 : f32 to vector<128x64xf32>
      %20 = arith.maximumf %18, %19 : vector<128x64xf32>
      %21 = arith.truncf %20 : vector<128x64xf32> to vector<128x64xbf16>
      %c0_17 = arith.constant 0 : index
      %c0_18 = arith.constant 0 : index
      %22 = vector.load %arg7[%c0_17, %c0_18] : memref<128x64xbf16, #tpu.memory_space<vmem>>, vector<128x64xbf16>
      tpu.vector_store %arg7[%c0_17, %c0_18], %21 {strides = array<i32>} : memref<128x64xbf16, #tpu.memory_space<vmem>>, vector<128x64xbf16>,
    } else {
    }
    return
  }
  func.func @transform_0(%arg0: i32, %arg1: i32, %arg2: i32) -> (i32, i32) {
    %c0_i32 = arith.constant 0 : i32
    return %arg0, %arg2 : i32, i32
  }
  func.func @transform_1(%arg0: i32, %arg1: i32, %arg2: i32) -> (i32, i32) {
    %c0_i32 = arith.constant 0 : i32
    return %arg2, %arg1 : i32, i32
  }
  func.func @transform_2(%arg0: i32, %arg1: i32, %arg2: i32) -> (i32, i32) {
    %c0_i32 = arith.constant 0 : i32
    %c0_i32_0 = arith.constant 0 : i32
    return %c0_i32, %arg1 : i32, i32
  }
  func.func @transform_3(%arg0: i32, %arg1: i32, %arg2: i32) -> (i32, i32) {
    %c0_i32 = arith.constant 0 : i32
    %c0_i32_0 = arith.constant 0 : i32
    return %c0_i32, %arg1 : i32, i32
  }
  func.func @transform_4(%arg0: i32, %arg1: i32, %arg2: i32) -> (i32, i32) {
    %c0_i32 = arith.constant 0 : i32
    return %arg0, %arg1 : i32, i32
  }
}

</mosaic_0001>

<bundles_post_ra>
// kernel: tpu_custom_call.1
= control target key start
LH: loop header
LB: loop body
LE: loop exit
PB: predicated region body
PF: predicated region fallthrough
CT: control target
= control target key end

     0   :  { %vm22_vm0 = vcmask 523264   ;;  %v610_v1 = vmov 0.0   ;;  %vm458_vm1 = vcmask 519168   ;;  %s822_s1 = inlined_call_operand.vmem [shape: bf16[128,64], index: 1, kind: input, shape index: {}]   ;;  %s823_s0 = inlined_call_operand.vmem [shape: bf16[128,128], index: 0, kind: input, shape index: {}]   ;;  %s824_s2 = inlined_call_operand.vmem [shape: f32[1,64], index: 2, kind: input, shape index: {}]   ;;  %s825_s3 = inlined_call_operand.vmem [shape: f32[1,64], index: 3, kind: input, shape index: {}]   ;;  %s826_s4 = inlined_call_operand.vmem [shape: bf16[128,64], index: 4, kind: output, shape index: {}]  }
   0x1   :  { %v594_v0 = vld [vmem:[%s822_s1] sm:$0xff]   ;;  %25 = vst.msk [vmem:[#allocation2 + $0x10] sm:$0xff] %vm22_vm0, %v610_v1  ;;  %23 = vst.msk [vmem:[#allocation2] sm:$0xff] %vm22_vm0, %v610_v1  ;;  %v595_v2 = vld [vmem:[%s822_s1 + $0x8] sm:$0xff]  }
   0x2   :  { %24 = vst.msk [vmem:[#allocation2 + $0x8] sm:$0xff] %vm22_vm0, %v610_v1  ;;  %26 = vst.msk [vmem:[#allocation2 + $0x18] sm:$0xff] %vm22_vm0, %v610_v1  ;;  %545 = vmatprep.subr.bf16.mxu0 %v594_v0  ;;  %577 = vmatprep.subr.bf16.mxu1 %v594_v0  ;;  %v596_v3 = vld [vmem:[%s822_s1 + $0x10] sm:$0xff]   ;;  %v597_v4 = vld [vmem:[%s822_s1 + $0x18] sm:$0xff]  }
   0x3   :  { %27 = vst.msk [vmem:[#allocation2 + $0x20] sm:$0xff] %vm22_vm0, %v610_v1  ;;  %28 = vst.msk [vmem:[#allocation2 + $0x28] sm:$0xff] %vm22_vm0, %v610_v1  ;;  %546 = vmatpush3.bf16.msra.mxu0 %v594_v0  ;;  %585 = vmatpush3.bf16.msra.mxu1 %v594_v0  ;;  %v602_v5 = vld [vmem:[%s823_s0] sm:$0xff]   ;;  %v599_v8 = vld [vmem:[%s822_s1 + $0x28] sm:$0xff]  }
   0x4   :  { %29 = vst.msk [vmem:[#allocation2 + $0x30] sm:$0xff] %vm22_vm0, %v610_v1  ;;  %30 = vst.msk [vmem:[#allocation2 + $0x38] sm:$0xff] %vm22_vm0, %v610_v1  ;;  %547 = vmatprep.subr.bf16.mxu0 %v595_v2  ;;  %578 = vmatprep.subr.bf16.mxu1 %v595_v2  ;;  %v603_v6 = vld [vmem:[%s823_s0 + $0x20] sm:$0xff]   ;;  %v600_v9 = vld [vmem:[%s822_s1 + $0x30] sm:$0xff]  }
   0x5   :  { %31 = vst.msk [vmem:[#allocation2 + $0x40] sm:$0xff] %vm22_vm0, %v610_v1  ;;  %32 = vst.msk [vmem:[#allocation2 + $0x48] sm:$0xff] %vm22_vm0, %v610_v1  ;;  %561 = vmatprep.mubr.bf16.mxu0 %v602_v5  ;;  %v598_v7 = vld [vmem:[%s822_s1 + $0x20] sm:$0xff]   ;;  %569 = vmatprep.mubr.bf16.mxu1 %v603_v6  ;;  %v601_v10 = vld [vmem:[%s822_s1 + $0x38] sm:$0xff]  }
   0x6   :  { %33 = vst.msk [vmem:[#allocation2 + $0x50] sm:$0xff] %vm22_vm0, %v610_v1  ;;  %34 = vst.msk [vmem:[#allocation2 + $0x58] sm:$0xff] %vm22_vm0, %v610_v1  ;;  %v604_v11 = vld [vmem:[%s823_s0 + $0x8] sm:$0xff]   ;;  %v606_v13 = vld [vmem:[%s823_s0 + $0x10] sm:$0xff]  }
   0x7   :  { %35 = vst.msk [vmem:[#allocation2 + $0x60] sm:$0xff] %vm22_vm0, %v610_v1  ;;  %36 = vst.msk [vmem:[#allocation2 + $0x68] sm:$0xff] %vm22_vm0, %v610_v1  ;;  %548 = vmatpush3.bf16.msra.mxu0 %v595_v2  ;;  %586 = vmatpush3.bf16.msra.mxu1 %v595_v2  ;;  %v605_v12 = vld [vmem:[%s823_s0 + $0x28] sm:$0xff]   ;;  %v607_v14 = vld [vmem:[%s823_s0 + $0x30] sm:$0xff]  }
   0x8   :  { %37 = vst.msk [vmem:[#allocation2 + $0x70] sm:$0xff] %vm22_vm0, %v610_v1  ;;  %38 = vst.msk [vmem:[#allocation2 + $0x78] sm:$0xff] %vm22_vm0, %v610_v1  ;;  %549 = vmatprep.subr.bf16.mxu0 %v596_v3  ;;  %579 = vmatprep.subr.bf16.mxu1 %v596_v3  ;;  %v608_v15 = vld [vmem:[%s823_s0 + $0x18] sm:$0xff]   ;;  %v41_v17 = vld [vmem:[#allocation2 + $0x10] sm:$0xff] }
   0x9   :  { %v609_v16 = vld [vmem:[%s823_s0 + $0x38] sm:$0xff]   ;;  %v39_v19 = vld [vmem:[#allocation2] sm:$0xff]  ;;  %v40_v29 = vld [vmem:[#allocation2 + $0x8] sm:$0xff] }
   0xa   :  { %v42_v23 = vld [vmem:[#allocation2 + $0x18] sm:$0xff]  ;;  %v43_v43 = vld [vmem:[#allocation2 + $0x20] sm:$0xff]  ;;  %v44_v55 = vld [vmem:[#allocation2 + $0x28] sm:$0xff] }
   0xb   :  { %550 = vmatpush3.bf16.msra.mxu0 %v596_v3  ;;  %587 = vmatpush3.bf16.msra.mxu1 %v596_v3  ;;  %v45_v41 = vld [vmem:[#allocation2 + $0x30] sm:$0xff]  ;;  %v711_v45 = vld [vmem:[%s824_s2] ss:$0 sm:$0xff]  ;;  %v46_v48 = vld [vmem:[#allocation2 + $0x38] sm:$0xff] }
   0xc   :  { %551 = vmatprep.subr.bf16.mxu0 %v597_v4  ;;  %580 = vmatprep.subr.bf16.mxu1 %v597_v4  ;;  %v47_v20 = vld [vmem:[#allocation2 + $0x40] sm:$0xff]  ;;  %v48_v30 = vld [vmem:[#allocation2 + $0x48] sm:$0xff] }
   0xd   :  { %v49_v18 = vld [vmem:[#allocation2 + $0x50] sm:$0xff]  ;;  %v50_v24 = vld [vmem:[#allocation2 + $0x58] sm:$0xff]  ;;  %v716_v50 = vld [vmem:[%s825_s3] ss:$0 sm:$0xff] }
   0xe   :  { %v51_v44 = vld [vmem:[#allocation2 + $0x60] sm:$0xff]  ;;  %v52_v56 = vld [vmem:[#allocation2 + $0x68] sm:$0xff] }
   0xf   :  { %552 = vmatpush3.bf16.msra.mxu0 %v597_v4  ;;  %588 = vmatpush3.bf16.msra.mxu1 %v597_v4  ;;  %v53_v42 = vld [vmem:[#allocation2 + $0x70] sm:$0xff]  ;;  %v54_v49 = vld [vmem:[#allocation2 + $0x78] sm:$0xff] }
  0x10   :  { %553 = vmatprep.subr.bf16.mxu0 %v598_v7  ;;  %581 = vmatprep.subr.bf16.mxu1 %v598_v7 }
  0x13   :  { %554 = vmatpush3.bf16.msra.mxu0 %v598_v7  ;;  %589 = vmatpush3.bf16.msra.mxu1 %v598_v7 }
  0x14   :  { %555 = vmatprep.subr.bf16.mxu0 %v599_v8  ;;  %582 = vmatprep.subr.bf16.mxu1 %v599_v8 }
  0x17   :  { %556 = vmatpush3.bf16.msra.mxu0 %v599_v8  ;;  %590 = vmatpush3.bf16.msra.mxu1 %v599_v8 }
  0x18   :  { %557 = vmatprep.subr.bf16.mxu0 %v600_v9  ;;  %583 = vmatprep.subr.bf16.mxu1 %v600_v9 }
  0x1b   :  { %558 = vmatpush3.bf16.msra.mxu0 %v600_v9  ;;  %591 = vmatpush3.bf16.msra.mxu1 %v600_v9 }
  0x1c   :  { %559 = vmatprep.subr.bf16.mxu0 %v601_v10  ;;  %584 = vmatprep.subr.bf16.mxu1 %v601_v10 }
  0x1f   :  { %560 = vmatpush3.bf16.msra.mxu0 %v601_v10  ;;  %592 = vmatpush3.bf16.msra.mxu1 %v601_v10 }
  0x22   :  { %562 = vmatmul.mubr.bf16.vlgmr.msra.gmra.mrb[0].mxu0 %v604_v11  ;;  %570 = vmatmul.mubr.bf16.vlgmr.msra.gmra.mrb[0].mxu1 %v605_v12 }
  0x23   :  { %565 = vmatprep.mubr.bf16.mxu0 %v606_v13  ;;  %573 = vmatprep.mubr.bf16.mxu1 %v607_v14 }
  0x2a   :  { %566 = vmatmul.mubr.bf16.gmra.mrb[4].mxu0 %v608_v15  ;;  %574 = vmatmul.mubr.bf16.gmra.mrb[4].mxu1 %v609_v16 }
  0xf5   :  { %v563_v21 = vpop.f32.mrb[0].mxu0  ;;  %v571_v22 = vpop.f32.mrb[0].mxu1 }
  0xf6   :  { %v282_v25 = vadd.f32 %v563_v21, %v41_v17  ;;  %v290_v26 = vadd.f32 %v571_v22, %v49_v18  ;;  %v217_v27 = vpop.f32.mrb[1].mxu0  ;;  %v249_v28 = vpop.f32.mrb[1].mxu1 }
  0xf7   :  { %v280_v31 = vadd.f32 %v217_v27, %v39_v19  ;;  %v288_v32 = vadd.f32 %v249_v28, %v47_v20  ;;  %v564_v33 = vpop.f32.mrb[2].mxu0  ;;  %v572_v34 = vpop.f32.mrb[2].mxu1 }
  0xf8   :  { %299 = vst.msk [vmem:[#allocation2 + $0x10] sm:$0xff] %vm22_vm0, %v282_v25  ;;  %307 = vst.msk [vmem:[#allocation2 + $0x50] sm:$0xff] %vm22_vm0, %v290_v26  ;;  %v283_v35 = vadd.f32 %v564_v33, %v42_v23  ;;  %v291_v36 = vadd.f32 %v572_v34, %v50_v24  ;;  %v220_v37 = vpop.f32.mrb[3].mxu0  ;;  %v252_v38 = vpop.f32.mrb[3].mxu1 }
  0xf9   :  { %297 = vst.msk [vmem:[#allocation2] sm:$0xff] %vm22_vm0, %v280_v31  ;;  %305 = vst.msk [vmem:[#allocation2 + $0x40] sm:$0xff] %vm22_vm0, %v288_v32  ;;  %v281_v39 = vadd.f32 %v220_v37, %v40_v29  ;;  %v289_v40 = vadd.f32 %v252_v38, %v48_v30 }
  0xfa   :  { %300 = vst.msk [vmem:[#allocation2 + $0x18] sm:$0xff] %vm22_vm0, %v283_v35  ;;  %308 = vst.msk [vmem:[#allocation2 + $0x58] sm:$0xff] %vm22_vm0, %v291_v36 }
  0xfb   :  { %298 = vst.msk [vmem:[#allocation2 + $0x8] sm:$0xff] %vm22_vm0, %v281_v39  ;;  %306 = vst.msk [vmem:[#allocation2 + $0x48] sm:$0xff] %vm22_vm0, %v289_v40 }
  0xfd   :  { %v567_v46 = vpop.f32.mrb[4].mxu0  ;;  %v575_v47 = vpop.f32.mrb[4].mxu1 }
  0xfe   :  { %v286_v51 = vadd.f32 %v567_v46, %v45_v41  ;;  %v294_v52 = vadd.f32 %v575_v47, %v53_v42  ;;  %v233_v53 = vpop.f32.mrb[5].mxu0  ;;  %v265_v54 = vpop.f32.mrb[5].mxu1 }
  0xff   :  { %v318_v57 = vld [vmem:[#allocation2 + $0x10] sm:$0xff]  ;;  %v284_v59 = vadd.f32 %v233_v53, %v43_v43  ;;  %v292_v60 = vadd.f32 %v265_v54, %v51_v44  ;;  %v568_v61 = vpop.f32.mrb[6].mxu0  ;;  %v576_v62 = vpop.f32.mrb[6].mxu1 }
 0x100   :  { %v326_v58 = vld [vmem:[#allocation2 + $0x50] sm:$0xff]  ;;  %v341_v63 = vmul.f32 %v711_v45, %v318_v57  ;;  %v316_v1 = vld [vmem:[#allocation2] sm:$0xff]  ;;  %303 = vst.msk [vmem:[#allocation2 + $0x30] sm:$0xff] %vm22_vm0, %v286_v51  ;;  %311 = vst.msk [vmem:[#allocation2 + $0x70] sm:$0xff] %vm22_vm0, %v294_v52  ;;  %v287_v3 = vadd.f32 %v568_v61, %v46_v48  ;;  %v295_v4 = vadd.f32 %v576_v62, %v54_v49  ;;  %v236_v5 = vpop.f32.mrb[7].mxu0  ;;  %v268_v6 = vpop.f32.mrb[7].mxu1 }
 0x101   :  { %v349_v0 = vmul.f32 %v711_v45, %v326_v58  ;;  %v324_v2 = vld [vmem:[#allocation2 + $0x40] sm:$0xff]  ;;  %v339_v7 = vmul.f32 %v711_v45, %v316_v1  ;;  %v319_v9 = vld [vmem:[#allocation2 + $0x18] sm:$0xff]  ;;  %301 = vst.msk [vmem:[#allocation2 + $0x20] sm:$0xff] %vm22_vm0, %v284_v59  ;;  %309 = vst.msk [vmem:[#allocation2 + $0x60] sm:$0xff] %vm22_vm0, %v292_v60  ;;  %v285_v11 = vadd.f32 %v236_v5, %v44_v55 }
 0x102   :  { %v347_v8 = vmul.f32 %v711_v45, %v324_v2  ;;  %v327_v10 = vld [vmem:[#allocation2 + $0x58] sm:$0xff]  ;;  %v293_v12 = vadd.f32 %v268_v6, %v52_v56  ;;  %v364_v13 = vadd.f32 %v716_v50, %v341_v63  ;;  %v342_v15 = vmul.f32 %v711_v45, %v319_v9  ;;  %v317_v17 = vld [vmem:[#allocation2 + $0x8] sm:$0xff]  ;;  %304 = vst.msk [vmem:[#allocation2 + $0x38] sm:$0xff] %vm22_vm0, %v287_v3 }
 0x103   :  { %v372_v14 = vadd.f32 %v716_v50, %v349_v0  ;;  %v350_v16 = vmul.f32 %v711_v45, %v327_v10  ;;  %v325_v18 = vld [vmem:[#allocation2 + $0x48] sm:$0xff]  ;;  %312 = vst.msk [vmem:[#allocation2 + $0x78] sm:$0xff] %vm22_vm0, %v295_v4  ;;  %v362_v19 = vadd.f32 %v716_v50, %v339_v7  ;;  %v340_v21 = vmul.f32 %v711_v45, %v317_v17 }
 0x104   :  { %v370_v20 = vadd.f32 %v716_v50, %v347_v8  ;;  %v348_v22 = vmul.f32 %v711_v45, %v325_v18  ;;  %302 = vst.msk [vmem:[#allocation2 + $0x28] sm:$0xff] %vm22_vm0, %v285_v11  ;;  %310 = vst.msk [vmem:[#allocation2 + $0x68] sm:$0xff] %vm22_vm0, %v293_v12  ;;  %v380_v23 = vmax.f32 %v364_v13, 0.0  ;;  %v365_v25 = vadd.f32 %v716_v50, %v342_v15 }
 0x105   :  { %v388_v24 = vmax.f32 %v372_v14, 0.0  ;;  %v373_v26 = vadd.f32 %v716_v50, %v350_v16  ;;  %v378_v27 = vmax.f32 %v362_v19, 0.0  ;;  %v363_v29 = vadd.f32 %v716_v50, %v340_v21 }
 0x106   :  { %v386_v28 = vmax.f32 %v370_v20, 0.0  ;;  %v371_v30 = vadd.f32 %v716_v50, %v348_v22  ;;  %v515_v31 = vpack.c.bf16 %v380_v23, %v380_v23  ;;  %v381_v33 = vmax.f32 %v365_v25, 0.0 }
 0x107   :  { %v523_v32 = vpack.c.bf16 %v388_v24, %v388_v24  ;;  %v389_v34 = vmax.f32 %v373_v26, 0.0  ;;  %v513_v35 = vpack.c.bf16 %v378_v27, %v378_v27  ;;  %v379_v37 = vmax.f32 %v363_v29, 0.0  ;;  %v322_v39 = vld [vmem:[#allocation2 + $0x30] sm:$0xff] }
 0x108   :  { %v521_v36 = vpack.c.bf16 %v386_v28, %v386_v28  ;;  %v387_v38 = vmax.f32 %v371_v30, 0.0  ;;  %v330_v40 = vld [vmem:[#allocation2 + $0x70] sm:$0xff]  ;;  %461 = vst.msk [vmem:[%s826_s4 + $0x8] sm:$0xf] %vm458_vm1, %v515_v31  ;;  %v516_v41 = vpack.c.bf16 %v381_v33, %v381_v33  ;;  %v345_v43 = vmul.f32 %v711_v45, %v322_v39  ;;  %v320_v46 = vld [vmem:[#allocation2 + $0x20] sm:$0xff] }
 0x109   :  { %469 = vst.msk [vmem:[%s826_s4 + $0x28] sm:$0xf] %vm458_vm1, %v523_v32  ;;  %v524_v42 = vpack.c.bf16 %v389_v34, %v389_v34  ;;  %v353_v44 = vmul.f32 %v711_v45, %v330_v40  ;;  %v328_v47 = vld [vmem:[#allocation2 + $0x60] sm:$0xff]  ;;  %459 = vst.msk [vmem:[%s826_s4] sm:$0xf] %vm458_vm1, %v513_v35  ;;  %v514_v48 = vpack.c.bf16 %v379_v37, %v379_v37  ;;  %v323_v53 = vld [vmem:[#allocation2 + $0x38] sm:$0xff] }
 0x10a   :  { %467 = vst.msk [vmem:[%s826_s4 + $0x20] sm:$0xf] %vm458_vm1, %v521_v36  ;;  %v522_v49 = vpack.c.bf16 %v387_v38, %v387_v38  ;;  %v343_v51 = vmul.f32 %v711_v45, %v320_v46  ;;  %v351_v52 = vmul.f32 %v711_v45, %v328_v47  ;;  %v331_v54 = vld [vmem:[#allocation2 + $0x78] sm:$0xff]  ;;  %462 = vst.msk [vmem:[%s826_s4 + $0xc] sm:$0xf] %vm458_vm1, %v516_v41 }
 0x10b   :  { %470 = vst.msk [vmem:[%s826_s4 + $0x2c] sm:$0xf] %vm458_vm1, %v524_v42  ;;  %v368_v55 = vadd.f32 %v716_v50, %v345_v43  ;;  %v376_v56 = vadd.f32 %v716_v50, %v353_v44  ;;  %v346_v57 = vmul.f32 %v711_v45, %v323_v53  ;;  %v354_v58 = vmul.f32 %v711_v45, %v331_v54  ;;  %v321_v59 = vld [vmem:[#allocation2 + $0x28] sm:$0xff] }
 0x10c   :  { %v329_v60 = vld [vmem:[#allocation2 + $0x68] sm:$0xff]  ;;  %460 = vst.msk [vmem:[%s826_s4 + $0x4] sm:$0xf] %vm458_vm1, %v514_v48  ;;  %468 = vst.msk [vmem:[%s826_s4 + $0x24] sm:$0xf] %vm458_vm1, %v522_v49  ;;  %v366_v61 = vadd.f32 %v716_v50, %v343_v51  ;;  %v374_v62 = vadd.f32 %v716_v50, %v351_v52  ;;  %v344_v63 = vmul.f32 %v711_v45, %v321_v59 }
 0x10d   :  { %v352_v0 = vmul.f32 %v711_v45, %v329_v60  ;;  %v384_v1 = vmax.f32 %v368_v55, 0.0  ;;  %v392_v2 = vmax.f32 %v376_v56, 0.0  ;;  %v369_v3 = vadd.f32 %v716_v50, %v346_v57 }
 0x10e   :  { %v377_v4 = vadd.f32 %v716_v50, %v354_v58  ;;  %v382_v5 = vmax.f32 %v366_v61, 0.0  ;;  %v390_v6 = vmax.f32 %v374_v62, 0.0  ;;  %v367_v7 = vadd.f32 %v716_v50, %v344_v63 }
 0x10f   :  { %v375_v8 = vadd.f32 %v716_v50, %v352_v0  ;;  %v519_v9 = vpack.c.bf16 %v384_v1, %v384_v1  ;;  %v527_v10 = vpack.c.bf16 %v392_v2, %v392_v2  ;;  %v385_v11 = vmax.f32 %v369_v3, 0.0 }
 0x110   :  { %v393_v12 = vmax.f32 %v377_v4, 0.0  ;;  %v517_v13 = vpack.c.bf16 %v382_v5, %v382_v5  ;;  %v525_v14 = vpack.c.bf16 %v390_v6, %v390_v6  ;;  %v383_v15 = vmax.f32 %v367_v7, 0.0 }
 0x111   :  { %v391_v45 = vmax.f32 %v375_v8, 0.0  ;;  %465 = vst.msk [vmem:[%s826_s4 + $0x18] sm:$0xf] %vm458_vm1, %v519_v9  ;;  %473 = vst.msk [vmem:[%s826_s4 + $0x38] sm:$0xf] %vm458_vm1, %v527_v10  ;;  %v520_v16 = vpack.c.bf16 %v385_v11, %v385_v11 }
 0x112   :  { %v528_v50 = vpack.c.bf16 %v393_v12, %v393_v12  ;;  %463 = vst.msk [vmem:[%s826_s4 + $0x10] sm:$0xf] %vm458_vm1, %v517_v13  ;;  %471 = vst.msk [vmem:[%s826_s4 + $0x30] sm:$0xf] %vm458_vm1, %v525_v14  ;;  %v518_v17 = vpack.c.bf16 %v383_v15, %v383_v15 }
 0x113   :  { %v526_v18 = vpack.c.bf16 %v391_v45, %v391_v45  ;;  %466 = vst.msk [vmem:[%s826_s4 + $0x1c] sm:$0xf] %vm458_vm1, %v520_v16 }
 0x114   :  { %474 = vst.msk [vmem:[%s826_s4 + $0x3c] sm:$0xf] %vm458_vm1, %v528_v50  ;;  %464 = vst.msk [vmem:[%s826_s4 + $0x14] sm:$0xf] %vm458_vm1, %v518_v17 }
 0x115   :  { %472 = vst.msk [vmem:[%s826_s4 + $0x34] sm:$0xf] %vm458_vm1, %v526_v18 }

</bundles_post_ra>
